<compile_context>
chip_gen: v5e
topology: v5e:2x2
jax: 0.10.0
libtpu: 0.0.40
codegen_flags: <defaults>
</compile_context>

<pallas_src>
from functools import partial

import jax
import jax.numpy as jnp
from jax.experimental import pallas as pl
from jax.experimental.pallas import tpu as pltpu

LEVELS = 8.0  # sketch quantization levels


# ----------------------------------------------------------------------------
# VMEM budgeting (generation aware: v7x = 64 MiB / TC, v5e/v6e = 128 MiB)
# ----------------------------------------------------------------------------
def _vmem_capacity_bytes():
    try:
        info = pltpu.get_tpu_info()
        for attr in ("vmem_capacity_bytes", "vmem_size_bytes", "vmem_bytes"):
            v = getattr(info, attr, None)
            if v:
                return int(v)
    except Exception:
        pass
    return 64 * 1024 * 1024          # conservative default (v7x per-TC VMEM)


def _vmem_limit_and_block_budget():
    cap = _vmem_capacity_bytes()
    if cap <= 64 * 1024 * 1024:      # v7x-class: leave headroom on 64 MiB
        limit = 48 * 1024 * 1024
    else:                            # v5e / v6e: use the bigger 128 MiB VMEM
        limit = 96 * 1024 * 1024
    return limit, (limit * 55) // 100   # ~55% of the limit for pipelined blocks


def _tile_candidates(n, q, cap):
    """Divisors of n that are multiples of q (up to cap), plus n itself."""
    cands = {n}
    t = q
    while t < n and t <= cap:
        if n % t == 0:
            cands.add(t)
        t += q
    return sorted(cands)


# ----------------------------------------------------------------------------
# Forward: non-differentiable "sketch" quantizer (elementwise, 2-D tiled)
# ----------------------------------------------------------------------------
def _sketch_kernel(x_ref, o_ref):
    x = x_ref[...]
    o_ref[...] = jnp.round(jnp.clip(x, 0.0, 1.0) * (LEVELS - 1.0)) / (LEVELS - 1.0)


def _forward_tiling(rows, lanes, itemsize, block_budget_bytes):
    """Pick (row_tile, lane_tile): fits the pipelined-block VMEM budget,
    prefers >=4 grid steps for pipelining / megacore, then the biggest tile."""
    sub_q = {4: 8, 2: 16, 1: 32}.get(itemsize, 8)      # packed-sublane quantum
    row_c = _tile_candidates(rows, sub_q, 8192)
    lane_c = _tile_candidates(lanes, 128, 65536)
    best = None
    for lt in lane_c:
        for rt in row_c:
            foot = 2 * 2 * rt * lt * itemsize          # dbl-buffer x (in + out)
            if foot > block_budget_bytes:
                continue
            steps = (rows // rt) * (lanes // lt)
            key = (min(steps, 4), rt * lt)
            if best is None or key > best[0]:
                best = (key, rt, lt)
    if best is None:                                   # nothing fits: smallest legal
        return row_c[0], lane_c[0]
    return best[1], best[2]


def sketch_pallas(x_nchw):
    N, C, H, W = x_nchw.shape
    rows, lanes = N * C, H * W
    x2d = x_nchw.reshape(rows, lanes)                  # free reshape (lane-dense)
    limit, budget = _vmem_limit_and_block_budget()
    rt, lt = _forward_tiling(rows, lanes, x2d.dtype.itemsize, budget)
    # NOTE: x is also saved as the VJP residual (live after this call), so
    # input_output_aliases={0: 0} would just force a copy -- intentionally omitted.
    out = pl.pallas_call(
        _sketch_kernel,
        out_shape=jax.ShapeDtypeStruct((rows, lanes), x2d.dtype),
        grid=(rows // rt, lanes // lt),
        in_specs=[pl.BlockSpec((rt, lt), lambda i, j: (i, j))],
        out_specs=pl.BlockSpec((rt, lt), lambda i, j: (i, j)),
        compiler_params=pltpu.CompilerParams(
            dimension_semantics=("parallel", "parallel"),
            vmem_limit_bytes=limit,
        ),
    )(x2d)
    return out.reshape(N, C, H, W)


# ----------------------------------------------------------------------------
# Backward: fused conv1 + ReLU + conv2 + surrogate-gradient multiply
# ----------------------------------------------------------------------------
def _bpda_bwd_kernel(x_ref, g_ref, w1_ref, b1_ref, w2_ref, b2_ref, m_ref, o_ref,
                     *, W, kb):
    """out = grad_output * conv2(relu(conv1(x))) for a chunk of `kb` images.

    Layout: channels on sublanes, flattened H*W on the lane axis (lane-dense
    stores).  Tap (dy,dx) of a 3x3 'same' conv reads pixel (i+dy-1, j+dx-1):
    realized as a circular lane roll plus a precomputed 0/1 border mask.  The
    9 masked taps are stacked along the contraction axis so each conv is ONE
    MXU matmul (K = 9*Cin) with in-MXU accumulation.
    """
    HW = m_ref.shape[1]
    masks = m_ref[...]                                 # (9, HW) f32, loaded once

    def tap_slab(inp):
        # inp (Cin, HW) -> (9*Cin, HW), tap-major rows, border taps zeroed.
        parts = []
        for dy in range(3):
            for dx in range(3):
                t = dy * 3 + dx
                off = (dy - 1) * W + (dx - 1)
                tap = inp if off == 0 else pltpu.roll(inp, shift=(-off) % HW, axis=1)
                parts.append(tap * masks[t:t + 1, :])
        return jnp.concatenate(parts, axis=0)

    for i in range(kb):                                # kb is small & static
        x = x_ref[i].astype(jnp.float32)               # (C,  HW) native -> f32
        g = g_ref[i].astype(jnp.float32)               # (C,  HW)
        h = jnp.maximum(
            jnp.dot(w1_ref[...], tap_slab(x), preferred_element_type=jnp.float32)
            + b1_ref[...], 0.0)                        # (HID, HW), stays in VMEM
        approx = (jnp.dot(w2_ref[...], tap_slab(h),
                          preferred_element_type=jnp.float32)
                  + b2_ref[...])                       # (C, HW), stays in VMEM
        o_ref[i] = (g * approx).astype(o_ref.dtype)


def _tap_masks(H, W):
    """(9, H*W) f32 masks: 1 where tap (dy,dx) stays inside the image."""
    ii, jj = jnp.meshgrid(jnp.arange(H), jnp.arange(W), indexing="ij")
    ms = []
    for dy in range(3):
        for dx in range(3):
            ok = ((ii + dy - 1 >= 0) & (ii + dy - 1 < H) &
                  (jj + dx - 1 >= 0) & (jj + dx - 1 < W))
            ms.append(ok.reshape(H * W))
    return jnp.stack(ms, 0).astype(jnp.float32)


def _pick_batch_tile(N, C, HW, HID, in_itemsize, out_itemsize, budget_bytes):
    """Images per grid step: fits VMEM budget, keeps >= 2 grid steps when N >= 2."""
    per_image = 2 * (2 * in_itemsize + out_itemsize) * C * HW   # x,g,out dbl-buffered
    static = (9 * HW * 4                                        # border masks
              + (9 * C + 9 * HID + 2 * (C + HID)) * HW * 4)     # transient slabs
    avail = max(budget_bytes - static, per_image)
    min_steps = 1 if N < 2 else 2
    best = 1
    for kb in range(1, N + 1):
        if N % kb:
            continue
        if kb * per_image > avail:
            continue
        if N // kb >= min_steps:
            best = kb
    return best


def bpda_backward_pallas(flat_params, x_nchw, g_nchw):
    N, C, H, W = x_nchw.shape
    HW = H * W
    w1, b1, w2, b2 = (flat_params["w1"], flat_params["b1"],
                      flat_params["w2"], flat_params["b2"])
    HID = w1.shape[0]
    masks = _tap_masks(H, W)
    limit, budget = _vmem_limit_and_block_budget()
    kb = _pick_batch_tile(N, C, HW, HID,
                          x_nchw.dtype.itemsize, x_nchw.dtype.itemsize, budget)

    # Native dtype across HBM (no wrapper upcast); f32 accumulation in-kernel.
    x2 = x_nchw.reshape(N, C, HW)                      # free reshapes
    g2 = g_nchw.reshape(N, C, HW)

    const2 = lambda b: (0, 0)   # weights / biases / masks: resident, DMA'd once
    out = pl.pallas_call(
        partial(_bpda_bwd_kernel, W=W, kb=kb),
        out_shape=jax.ShapeDtypeStruct((N, C, HW), x_nchw.dtype),
        grid=(N // kb,),
        in_specs=[
            pl.BlockSpec((kb, C, HW), lambda b: (b, 0, 0)),    # x chunk
            pl.BlockSpec((kb, C, HW), lambda b: (b, 0, 0)),    # grad_output chunk
            pl.BlockSpec((HID, 9 * C), const2),                # conv1 weights (flat)
            pl.BlockSpec((HID, 1), const2),                    # conv1 bias
            pl.BlockSpec((C, 9 * HID), const2),                # conv2 weights (flat)
            pl.BlockSpec((C, 1), const2),                      # conv2 bias
            pl.BlockSpec((9, HW), const2),                     # border masks
        ],
        out_specs=pl.BlockSpec((kb, C, HW), lambda b: (b, 0, 0)),
        compiler_params=pltpu.CompilerParams(
            dimension_semantics=("parallel",),   # v7x: batch chunks split across TCs
            vmem_limit_bytes=limit,
        ),
    )(x2, g2, w1, b1, w2, b2, masks)
    return out.reshape(N, C, H, W)


# ----------------------------------------------------------------------------
# BPDASketcher: forward = non_diff_layer(x); backward = g * grad_approx_net(x)
# ----------------------------------------------------------------------------
def make_bpda_sketcher(params):
    """params use PyTorch Conv2d layout: w (O, Cin, 3, 3), b (O,)."""
    def to_flat(w):                      # (O, Cin, 3, 3) -> (O, 9*Cin), tap-major
        O, Cin = w.shape[:2]
        return jnp.transpose(w, (0, 2, 3, 1)).reshape(O, 9 * Cin)

    flat_params = {
        "w1": to_flat(params["w1"]).astype(jnp.float32),
        "b1": params["b1"].reshape(-1, 1).astype(jnp.float32),
        "w2": to_flat(params["w2"]).astype(jnp.float32),
        "b2": params["b2"].reshape(-1, 1).astype(jnp.float32),
    }

    @jax.custom_vjp
    def bpda(x):
        return sketch_pallas(x)

    def fwd(x):
        return sketch_pallas(x), x       # mirrors ctx.save_for_backward(input)

    def bwd(x, grad_output):
        return (bpda_backward_pallas(flat_params, x, grad_output),)

    bpda.defvjp(fwd, bwd)
    return bpda


# ----------------------------------------------------------------------------
if __name__ == "__main__":
    key = jax.random.PRNGKey(0)
    k1, k2, k3, k4, kx, kg = jax.random.split(key, 6)

    N, C, H, W = 2, 4, 16, 16
    HID = 8

    params = {
        "w1": 0.1 * jax.random.normal(k1, (HID, C, 3, 3), jnp.float32),
        "b1": 0.1 * jax.random.normal(k3, (HID,), jnp.float32),
        "w2": 0.1 * jax.random.normal(k2, (C, HID, 3, 3), jnp.float32),
        "b2": 0.1 * jax.random.normal(k4, (C,), jnp.float32),
    }
    x = jax.random.uniform(kx, (N, C, H, W), dtype=jnp.float32)
    gt = jax.random.normal(kg, (N, C, H, W), jnp.float32)   # upstream cotangent

    bpda = make_bpda_sketcher(params)

    # forward: non-diff sketch layer (tiled elementwise Pallas kernel)
    y = jax.jit(bpda)(x)
    jax.block_until_ready(y)
    assert y.shape == x.shape and y.dtype == x.dtype

    # backward: BPDA surrogate gradient via the single fused Pallas kernel
    pullback = jax.jit(lambda v, ct: jax.vjp(bpda, v)[1](ct)[0])
    gx = pullback(x, gt)
    jax.block_until_ready(gx)
    assert gx.shape == x.shape and gx.dtype == x.dtype

    # ---- numerical check against a pure-JAX / XLA reference -----------------
    y_ref = jnp.round(jnp.clip(x, 0.0, 1.0) * (LEVELS - 1.0)) / (LEVELS - 1.0)

    def ref_conv(z, w, b):
        o = jax.lax.conv_general_dilated(
            z, w, window_strides=(1, 1), padding="SAME",
            dimension_numbers=("NCHW", "OIHW", "NCHW"))
        return o + b.reshape(1, -1, 1, 1)

    approx_ref = ref_conv(jax.nn.relu(ref_conv(x, params["w1"], params["b1"])),
                          params["w2"], params["b2"])
    gx_ref = gt * approx_ref

    assert jnp.allclose(y, y_ref, atol=1e-6), "sketch forward mismatch"
    assert jnp.allclose(gx, gx_ref, rtol=2e-2, atol=2e-2), "BPDA backward mismatch"

    print("KERNEL_OK")
</pallas_src>

<mosaic_0001>
module attributes {stable_mosaic.version = 11 : i64} {
  func.func @_sketch_kernel(%arg0: i32, %arg1: i32, %arg2: memref<8x128xf32, #tpu.memory_space<vmem>>, %arg3: memref<8x128xf32, #tpu.memory_space<vmem>>) attributes {dimension_semantics = [#tpu.dimension_semantics<parallel>, #tpu.dimension_semantics<parallel>], iteration_bounds = array<i64: 1, 2>, scalar_prefetch = 0 : i64, scratch_operands = 0 : i64, tpu.core_type = #tpu.core_type<tc>, window_params = [{transform_indices = @transform_0, window_bounds = array<i64: 8, 128>}, {transform_indices = @transform_1, window_bounds = array<i64: 8, 128>}]} {
    %c0 = arith.constant 0 : index
    %c0_0 = arith.constant 0 : index
    %0 = vector.load %arg2[%c0, %c0_0] : memref<8x128xf32, #tpu.memory_space<vmem>>, vector<8x128xf32>
    %cst = arith.constant 0.000000e+00 : f32
    %cst_1 = arith.constant 1.000000e+00 : f32
    %1 = vector.broadcast %cst : f32 to vector<8x128xf32>
    %2 = arith.maximumf %1, %0 : vector<8x128xf32>
    %3 = vector.broadcast %cst_1 : f32 to vector<8x128xf32>
    %4 = arith.minimumf %3, %2 : vector<8x128xf32>
    %cst_2 = arith.constant 7.000000e+00 : f32
    %5 = vector.broadcast %cst_2 : f32 to vector<8x128xf32>
    %6 = arith.mulf %4, %5 : vector<8x128xf32>
    %7 = math.roundeven %6 : vector<8x128xf32>
    %cst_3 = arith.constant 7.000000e+00 : f32
    %8 = vector.broadcast %cst_3 : f32 to vector<8x128xf32>
    %9 = arith.divf %7, %8 : vector<8x128xf32>
    %c0_4 = arith.constant 0 : index
    %c0_5 = arith.constant 0 : index
    %10 = vector.load %arg3[%c0_4, %c0_5] : memref<8x128xf32, #tpu.memory_space<vmem>>, vector<8x128xf32>
    tpu.vector_store %arg3[%c0_4, %c0_5], %9 {strides = array<i32>} : memref<8x128xf32, #tpu.memory_space<vmem>>, vector<8x128xf32>,
    return
  }
  func.func @transform_0(%arg0: i32, %arg1: i32) -> (i32, i32) {
    %c0_i32 = arith.constant 0 : i32
    return %arg0, %arg1 : i32, i32
  }
  func.func @transform_1(%arg0: i32, %arg1: i32) -> (i32, i32) {
    %c0_i32 = arith.constant 0 : i32
    return %arg0, %arg1 : i32, i32
  }
}

</mosaic_0001>

<bundles_post_ra>
// kernel: bpda.1
= control target key start
LH: loop header
LB: loop body
LE: loop exit
PB: predicated region body
PF: predicated region fallthrough
CT: control target
= control target key end

     0   :  { %s324_s6 = smov 0   ;;  %s326_s7 = smov 0   ;;  %s357_s0 = inlined_call_operand.vmem [shape: f32[8,256], index: 0, kind: input, shape index: {}]   ;;  %s358_s1 = inlined_call_operand.vmem [shape: f32[8,256], index: 1, kind: output, shape index: {}]  }
   0x1   :  { %s328_s8 = smov 0  }
   0x2 LB: > { %s20_s9 = sadd.s32 1, %s307_s7  ;;  %p249_p0 = scmp.ge.s32.totalorder %s311_s8, 1  ;;  %s311_s8 = sphi %s328_s8, %s11_s8   ;;  %s307_s7 = sphi %s326_s7, %s360_s7   ;;  %s303_s6 = sphi %s324_s6, %s359_s6  }
   0x3   : > { %p21_p1 = scmp.ge.s32.totalorder %s20_s9, 2  ;;  %p106_p2 = scmp.lt.s32.totalorder %s311_s8, 3 }
   0x5   : > { %s362_s9 = smov (%p21_p1, %s20_s9), 0  ;;  %p107_p3 = pnand %p249_p0, %p106_p2 }
   0x6   : > { %p134_p4 = scmp.lt.s32.totalorder (!%p107_p3), %s303_s6, 1 }
   0x7   : > { %110 = sbr.rel (%p107_p3) target bundleno = 34 (0x22), region = 24 }
   0xc   : > { %v313_v0 = vmov 7.0   ;;  %s364_s6 = smov (!%p134_p4, %s303_s6), 1 }
   0xd   : > { %287 = vrcp.f32 %v313_v0  ;;  %s250_s10 = sshll.u32 %s364_s6, 3 }
   0xe   : > { %s139_s13 = scalar_lea.vmem %s357_s0, %s250_s10  ;;  %s147_s16 = scalar_lea.vmem %s358_s1, %s250_s10 }
   0xf   : > { %v148_v1 = vld [vmem:[%s139_s13] sm:$0xff] }
  0x10   : > { %v149_v3 = vmax.f32 %v148_v1, 0.0 }
  0x12   : > { %v150_v5 = vmin.f32 %v149_v3, 1.0 }
  0x13   : > { %v288_v2 = vpop.eup %287 }
  0x14   : > { %v154_v4 = vmul.f32 7.0, %v288_v2  ;;  %v151_v7 = vmul.f32 7.0, %v150_v5  ;;  %vm158_vm0 = vweird.f32 %v288_v2 }
  0x16   : > { %v155_v6 = vsub.f32 1.0, %v154_v4  ;;  %v256_v9 = vcvt.f32.s32 %v151_v7  ;;  %v254_v10 = vand.u32 2147483647, %v151_v7  ;;  %v259_v12 = vand.u32 2147483648, %v151_v7 }
  0x18   : > { %v156_v8 = vmul.f32 %v288_v2, %v155_v6  ;;  %v257_v11 = vcvt.s32.f32 %v256_v9  ;;  %vm255_vm1 = vcmp.lt.f32.partialorder %v254_v10, 8388608.0 }
  0x1a   : > { %v157_v13 = vadd.f32 %v288_v2, %v156_v8  ;;  %v258_v14 = vand.u32 2147483647, %v257_v11 }
  0x1c   : > { %v260_v15 = vor.u32 %v259_v12, %v258_v14  ;;  %v159_v16 = vsel %vm158_vm0, %v288_v2, %v157_v13 }
  0x1e   : > { %v261_v17 = vsel %vm255_vm1, %v260_v15, %v151_v7 }
  0x1f   : > { %v160_v18 = vmul.f32 %v261_v17, %v159_v16 }
  0x21   : > { %161 = vst [vmem:[%s147_s16] sm:$0xff] %v160_v18 }
  0x22 PF: > { %s11_s8 = sadd.s32 1, %s311_s8   ;;  %s359_s6 = smov %s307_s7 }
  0x23   : > { %p8_p5 = scmp.ge.s32.totalorder %s11_s8, 4   ;;  %s360_s7 = smov %s362_s9 }
  0x25   :  { %10 = sbr.rel (!%p8_p5) target bundleno = 2 (0x2), region = 54 }

</bundles_post_ra>
